<compile_context>
chip_gen: v7x
topology: tpu7x:2x2x1
jax: 0.10.0
libtpu: 0.0.40
codegen_flags: <defaults>
</compile_context>

<pallas_src>
import functools

import jax
import jax.numpy as jnp
from jax.experimental import pallas as pl
from jax.experimental.pallas import tpu as pltpu


def _round_up(x, m):
    return (x + m - 1) // m * m


def _cdiv(a, b):
    return -(-a // b)


def hybrid_embed_kernel(pat_ref, w1_ref, b1_ref, w2_ref, b2_ref, out_ref):
    # Backbone conv (im2col matmul, bf16 in / f32 acc) + bias + ReLU in f32.
    feat = jnp.dot(pat_ref[...], w1_ref[...], preferred_element_type=jnp.float32)
    feat = jnp.maximum(feat + b1_ref[...], 0.0)
    # Projection: Linear(feature_dim, embed_dim), bf16 in / f32 acc, f32 bias.
    out = jnp.dot(feat.astype(w2_ref.dtype), w2_ref[...],
                  preferred_element_type=jnp.float32) + b2_ref[...]
    out_ref[...] = out.astype(out_ref.dtype)


def im2col_s2_k3_p1(x_nchw, dtype=jnp.bfloat16):
    """3x3 / stride-2 / pad-1 patches, C-major / (kh,kw)-minor.

    Returns ((B*Hf*Wf, C*9) in `dtype`, Hf, Wf)."""
    B, C, H, W = x_nchw.shape
    Hf, Wf = (H + 1) // 2, (W + 1) // 2          # conv output spatial size
    xp = jnp.pad(x_nchw.astype(dtype), ((0, 0), (0, 0), (1, 1), (1, 1)))
    taps = []
    for dh in range(3):
        for dw in range(3):
            taps.append(xp[:, :, dh:dh + 2 * Hf:2, dw:dw + 2 * Wf:2])  # (B,C,Hf,Wf)
    pat = jnp.stack(taps, axis=2)                 # (B, C, 9, Hf, Wf)
    pat = jnp.transpose(pat, (0, 3, 4, 1, 2))     # (B, Hf, Wf, C, 9)
    pat = pat.reshape(B * Hf * Wf, C * 9)         # matches conv_w.reshape(C_out, C*9)
    return pat, Hf, Wf


def _vmem_capacity_bytes():
    try:
        info = pltpu.get_tpu_info()
        cap = getattr(info, "vmem_capacity_bytes", None)
        if cap:
            return int(cap)
    except Exception:
        pass
    return 64 << 20   # conservative default = v7x per-TensorCore VMEM


def _vmem_bytes(tm, k1, cp, ep, out_bytes):
    """Approximate VMEM footprint with everything counted double-buffered."""
    k1_lane = _round_up(k1, 128)       # pat tile is lane-padded inside VMEM
    k1_sub = _round_up(k1, 16)         # bf16 sublane padding of the conv weight
    return (2 * tm * k1_lane * 2                      # pat tiles (bf16)
            + 2 * tm * ep * out_bytes                 # out tiles
            + 2 * (k1_sub * cp * 2 + cp * ep * 2)     # conv / proj weights (bf16)
            + 2 * (8 * cp * 4 + 8 * ep * 4)           # biases (f32)
            + tm * cp * 4 + tm * ep * 4)              # f32 intermediates (feat, pre-cast out)


def _choose_tm(m, tm_max, k1, cp, ep, out_bytes, vmem_cap):
    mp128 = _round_up(m, 128)
    tm = min(_round_up(tm_max, 128), mp128)
    # Guarantee >= 2 grid steps (when there are enough rows) so the "parallel" M
    # axis can be sharded across both v7x TensorCores.
    if mp128 >= 256 and _cdiv(mp128, tm) < 2:
        tm = _round_up(mp128 // 2, 128)
    # Bound last-tile zero-row waste (a mostly-empty final tile is wasted MXU + HBM write).
    while tm > 128 and (_cdiv(m, tm) * tm - m) > tm // 2:
        tm -= 128
    # Fit the double-buffered footprint under the generation-aware VMEM cap.
    while tm > 128 and _vmem_bytes(tm, k1, cp, ep, out_bytes) > vmem_cap:
        tm -= 128
    return tm


@functools.partial(jax.jit, static_argnames=("tm", "out_dtype"))
def hybrid_embed(x_nchw, conv_w, conv_b, proj_w, proj_b, *, tm=1024,
                 out_dtype=jnp.bfloat16):
    """x_nchw: (B, C_in, H, W) float32.
    conv_w: (C_feat, C_in, 3, 3), conv_b: (C_feat,)
    proj_w: (embed_dim, C_feat)  (torch Linear weight layout), proj_b: (embed_dim,)
    returns (B, Hf*Wf, embed_dim) in out_dtype (bf16 by default)."""
    B = x_nchw.shape[0]
    pat, Hf, Wf = im2col_s2_k3_p1(x_nchw)         # bf16, (M, K1)
    M, K1 = pat.shape
    C_feat = conv_w.shape[0]
    E = proj_w.shape[0]

    LANE = 128
    Cp = _round_up(C_feat, LANE)
    Ep = _round_up(E, LANE)
    out_bytes = jnp.dtype(out_dtype).itemsize

    vmem_cap = int(0.7 * _vmem_capacity_bytes())
    TM = _choose_tm(M, tm, K1, Cp, Ep, out_bytes, vmem_cap)
    Mp = _round_up(M, TM)
    grid = (Mp // TM,)

    # Row-pad pat up to Mp.  K1 is intentionally NOT padded in HBM: the last block
    # dim equals the full array dim, and Mosaic pads the contraction dim in-register.
    pat_p = jnp.pad(pat, ((0, Mp - M), (0, 0)))

    # Zero-padded bf16 matmul operands; biases stay f32.  Padding is numerically
    # free (padded Cp/Ep columns are zero and sliced off below).
    w1 = jnp.zeros((K1, Cp), jnp.bfloat16).at[:, :C_feat].set(
        conv_w.reshape(C_feat, K1).T.astype(jnp.bfloat16))
    b1 = jnp.zeros((1, Cp), jnp.float32).at[:, :C_feat].set(conv_b.reshape(1, C_feat))
    w2 = jnp.zeros((Cp, Ep), jnp.bfloat16).at[:C_feat, :E].set(
        proj_w.T.astype(jnp.bfloat16))
    b2 = jnp.zeros((1, Ep), jnp.float32).at[:, :E].set(proj_b.reshape(1, E))

    # Advisory cost estimate for XLA scheduling around the custom call (kept in
    # sync with the bf16 output and un-padded K1 traffic).
    flops = 2 * Mp * (K1 * Cp + Cp * Ep)
    bytes_accessed = (Mp * K1 * 2 + K1 * Cp * 2 + Cp * Ep * 2
                      + Cp * 4 + Ep * 4 + Mp * Ep * out_bytes)

    vmem_limit = int(min(max(2 * _vmem_bytes(TM, K1, Cp, Ep, out_bytes), 32 << 20),
                         vmem_cap))

    out_flat = pl.pallas_call(
        hybrid_embed_kernel,
        out_shape=jax.ShapeDtypeStruct((Mp, Ep), out_dtype),
        grid_spec=pltpu.PrefetchScalarGridSpec(
            num_scalar_prefetch=0,
            grid=grid,
            in_specs=[
                pl.BlockSpec((TM, K1), lambda i: (i, 0)),    # patch rows: tiled over M
                pl.BlockSpec((K1, Cp), lambda i: (0, 0)),    # conv weight: resident
                pl.BlockSpec((1, Cp), lambda i: (0, 0)),     # conv bias:  resident
                pl.BlockSpec((Cp, Ep), lambda i: (0, 0)),    # proj weight: resident
                pl.BlockSpec((1, Ep), lambda i: (0, 0)),     # proj bias:  resident
            ],
            out_specs=pl.BlockSpec((TM, Ep), lambda i: (i, 0)),
        ),
        compiler_params=pltpu.CompilerParams(
            dimension_semantics=("parallel",),
            vmem_limit_bytes=vmem_limit,
        ),
        cost_estimate=pl.CostEstimate(flops=flops, transcendentals=0,
                                      bytes_accessed=bytes_accessed),
    )(pat_p, w1, b1, w2, b2)

    # Strip M/E padding; the Pallas output is lane-dense so this is layout-free.
    return out_flat[:M, :E].reshape(B, Hf * Wf, E)


if __name__ == "__main__":
    # Small shapes: batch=2, in_chans=4, img 16x16 -> feature map 8x8 with
    # feature_dim=16 -> num_patches=64 -> embed_dim=32.
    B, C_in, H, W = 2, 4, 16, 16
    C_feat, E = 16, 32

    key = jax.random.PRNGKey(0)
    kx, kcw, kcb, kpw, kpb = jax.random.split(key, 5)
    x = jax.random.normal(kx, (B, C_in, H, W), dtype=jnp.float32)
    conv_w = jax.random.normal(kcw, (C_feat, C_in, 3, 3), dtype=jnp.float32) * 0.1
    conv_b = jax.random.normal(kcb, (C_feat,), dtype=jnp.float32) * 0.1
    proj_w = jax.random.normal(kpw, (E, C_feat), dtype=jnp.float32) * 0.1
    proj_b = jax.random.normal(kpb, (E,), dtype=jnp.float32) * 0.1

    out = hybrid_embed(x, conv_w, conv_b, proj_w, proj_b)
    out = jax.block_until_ready(out)

    Hf, Wf = (H + 1) // 2, (W + 1) // 2
    assert out.shape == (B, Hf * Wf, E), out.shape
    assert out.dtype == jnp.bfloat16, out.dtype

    # Pure-JAX reference mirroring the kernel's bf16-in / f32-accumulate / bf16-out casts.
    pat, _, _ = im2col_s2_k3_p1(x)
    pat_f = pat.astype(jnp.float32)
    w1_f = conv_w.reshape(C_feat, -1).T.astype(jnp.bfloat16).astype(jnp.float32)
    feat = jnp.maximum(pat_f @ w1_f + conv_b, 0.0)
    feat_f = feat.astype(jnp.bfloat16).astype(jnp.float32)
    w2_f = proj_w.T.astype(jnp.bfloat16).astype(jnp.float32)
    ref = (feat_f @ w2_f + proj_b).astype(jnp.bfloat16).astype(jnp.float32)
    ref = ref.reshape(B, Hf * Wf, E)

    err = float(jnp.max(jnp.abs(out.astype(jnp.float32) - ref)))
    assert jnp.allclose(out.astype(jnp.float32), ref, atol=2e-2, rtol=2e-2), err

    print("KERNEL_OK")
</pallas_src>

<mosaic_0001>
module attributes {stable_mosaic.version = 11 : i64} {
  func.func @hybrid_embed_kernel(%arg0: i32, %arg1: memref<128x36xbf16, #tpu.memory_space<vmem>>, %arg2: memref<36x128xbf16, #tpu.memory_space<vmem>>, %arg3: memref<1x128xf32, #tpu.memory_space<vmem>>, %arg4: memref<128x128xbf16, #tpu.memory_space<vmem>>, %arg5: memref<1x128xf32, #tpu.memory_space<vmem>>, %arg6: memref<128x128xbf16, #tpu.memory_space<vmem>>) attributes {dimension_semantics = [#tpu.dimension_semantics<parallel>], iteration_bounds = array<i64: 1>, scalar_prefetch = 0 : i64, scratch_operands = 0 : i64, tpu.core_type = #tpu.core_type<tc>, window_params = [{transform_indices = @transform_0, window_bounds = array<i64: 128, 36>}, {pipeline_mode = #tpu.pipeline_mode<synchronous>, transform_indices = @transform_1, window_bounds = array<i64: 36, 128>}, {pipeline_mode = #tpu.pipeline_mode<synchronous>, transform_indices = @transform_2, window_bounds = array<i64: 1, 128>}, {pipeline_mode = #tpu.pipeline_mode<synchronous>, transform_indices = @transform_3, window_bounds = array<i64: 128, 128>}, {pipeline_mode = #tpu.pipeline_mode<synchronous>, transform_indices = @transform_4, window_bounds = array<i64: 1, 128>}, {transform_indices = @transform_5, window_bounds = array<i64: 128, 128>}]} {
    %c0 = arith.constant 0 : index
    %c0_0 = arith.constant 0 : index
    %0 = vector.load %arg1[%c0, %c0_0] : memref<128x36xbf16, #tpu.memory_space<vmem>>, vector<128x36xbf16>
    %c0_1 = arith.constant 0 : index
    %c0_2 = arith.constant 0 : index
    %1 = vector.load %arg2[%c0_1, %c0_2] : memref<36x128xbf16, #tpu.memory_space<vmem>>, vector<36x128xbf16>
    %cst = arith.constant dense<0.000000e+00> : vector<128x128xf32>
    %2 = tpu.matmul %0, %1, %cst {dimension_numbers = #tpu.dot_dimension_numbers<[1], [0], [0], [1], [0, 0, 1, 1], [], []>} : vector<128x36xbf16>, vector<36x128xbf16>, vector<128x128xf32> -> vector<128x128xf32>
    %c0_3 = arith.constant 0 : index
    %c0_4 = arith.constant 0 : index
    %3 = vector.load %arg3[%c0_3, %c0_4] : memref<1x128xf32, #tpu.memory_space<vmem>>, vector<1x128xf32>
    %4 = vector.broadcast %3 : vector<1x128xf32> to vector<128x128xf32>
    %5 = arith.addf %2, %4 : vector<128x128xf32>
    %cst_5 = arith.constant 0.000000e+00 : f32
    %6 = vector.broadcast %cst_5 : f32 to vector<128x128xf32>
    %7 = arith.maximumf %5, %6 : vector<128x128xf32>
    %8 = arith.truncf %7 : vector<128x128xf32> to vector<128x128xbf16>
    %c0_6 = arith.constant 0 : index
    %c0_7 = arith.constant 0 : index
    %9 = vector.load %arg4[%c0_6, %c0_7] : memref<128x128xbf16, #tpu.memory_space<vmem>>, vector<128x128xbf16>
    %cst_8 = arith.constant dense<0.000000e+00> : vector<128x128xf32>
    %10 = tpu.matmul %8, %9, %cst_8 {dimension_numbers = #tpu.dot_dimension_numbers<[1], [0], [0], [1], [0, 0, 1, 1], [], []>} : vector<128x128xbf16>, vector<128x128xbf16>, vector<128x128xf32> -> vector<128x128xf32>
    %c0_9 = arith.constant 0 : index
    %c0_10 = arith.constant 0 : index
    %11 = vector.load %arg5[%c0_9, %c0_10] : memref<1x128xf32, #tpu.memory_space<vmem>>, vector<1x128xf32>
    %12 = vector.broadcast %11 : vector<1x128xf32> to vector<128x128xf32>
    %13 = arith.addf %10, %12 : vector<128x128xf32>
    %14 = arith.truncf %13 : vector<128x128xf32> to vector<128x128xbf16>
    %c0_11 = arith.constant 0 : index
    %c0_12 = arith.constant 0 : index
    %15 = vector.load %arg6[%c0_11, %c0_12] : memref<128x128xbf16, #tpu.memory_space<vmem>>, vector<128x128xbf16>
    tpu.vector_store %arg6[%c0_11, %c0_12], %14 {strides = array<i32>} : memref<128x128xbf16, #tpu.memory_space<vmem>>, vector<128x128xbf16>,
    return
  }
  func.func @transform_0(%arg0: i32) -> (i32, i32) {
    %c0_i32 = arith.constant 0 : i32
    %c0_i32_0 = arith.constant 0 : i32
    return %arg0, %c0_i32 : i32, i32
  }
  func.func @transform_1(%arg0: i32) -> (i32, i32) {
    %c0_i32 = arith.constant 0 : i32
    %c0_i32_0 = arith.constant 0 : i32
    %c0_i32_1 = arith.constant 0 : i32
    return %c0_i32, %c0_i32_0 : i32, i32
  }
  func.func @transform_2(%arg0: i32) -> (i32, i32) {
    %c0_i32 = arith.constant 0 : i32
    %c0_i32_0 = arith.constant 0 : i32
    %c0_i32_1 = arith.constant 0 : i32
    return %c0_i32, %c0_i32_0 : i32, i32
  }
  func.func @transform_3(%arg0: i32) -> (i32, i32) {
    %c0_i32 = arith.constant 0 : i32
    %c0_i32_0 = arith.constant 0 : i32
    %c0_i32_1 = arith.constant 0 : i32
    return %c0_i32, %c0_i32_0 : i32, i32
  }
  func.func @transform_4(%arg0: i32) -> (i32, i32) {
    %c0_i32 = arith.constant 0 : i32
    %c0_i32_0 = arith.constant 0 : i32
    %c0_i32_1 = arith.constant 0 : i32
    return %c0_i32, %c0_i32_0 : i32, i32
  }
  func.func @transform_5(%arg0: i32) -> (i32, i32) {
    %c0_i32 = arith.constant 0 : i32
    %c0_i32_0 = arith.constant 0 : i32
    return %arg0, %c0_i32 : i32, i32
  }
}

</mosaic_0001>

<bundles_post_ra>
// kernel: hybrid_embed.1
= control target key start
LH: loop header
LB: loop body
LE: loop exit
PB: predicated region body
PF: predicated region fallthrough
CT: control target
= control target key end

     0   :  { %vm104_vm0 = vcmask 293888   ;;  %vm129_vm1 = vcmask 1041408   ;;  %s856_s1 = inlined_call_operand.vmem [shape: bf16[36,128], index: 1, kind: input, shape index: {}]   ;;  %s857_s0 = inlined_call_operand.vmem [shape: bf16[128,36], index: 0, kind: input, shape index: {}]   ;;  %s858_s3 = inlined_call_operand.vmem [shape: bf16[128,128], index: 3, kind: input, shape index: {}]   ;;  %s859_s2 = inlined_call_operand.vmem [shape: f32[1,128], index: 2, kind: input, shape index: {}]   ;;  %s860_s4 = inlined_call_operand.vmem [shape: f32[1,128], index: 4, kind: input, shape index: {}]   ;;  %s861_s5 = inlined_call_operand.vmem [shape: bf16[128,128], index: 5, kind: output, shape index: {}]  }
   0x1   :  { %v712_v0 = vld [vmem:[%s856_s1] sm:$0xff]   ;;  %v713_v1 = vld [vmem:[%s856_s1 + $0x8] sm:$0xff]   ;;  %v714_v2 = vld [vmem:[%s856_s1 + $0x10] ss:$0 sps:$4 sm:$0x33]  }
   0x2   :  { %641 = vmatprep.subr.bf16.mxu0 %v712_v0  ;;  %v715_v3 = vld [vmem:[%s857_s0] sm:$0xff]   ;;  %v131_v4 = vsel %vm129_vm1, %v714_v2, 0  ;;  %v716_v5 = vld [vmem:[%s857_s0 + $0x8] sm:$0xff]   ;;  %v717_v6 = vld [vmem:[%s857_s0 + $0x10] sm:$0xff]  }
   0x3   :  { %642 = vmatpush3.bf16.msra.mxu0 %v712_v0  ;;  %647 = vmatprep.mubr.msk.bf16.mxu0 %vm104_vm0, %v715_v3  ;;  %v723_v7 = vld [vmem:[%s858_s3] sm:$0xff]   ;;  %v724_v8 = vld [vmem:[%s858_s3 + $0x8] sm:$0xff]   ;;  %v725_v9 = vld [vmem:[%s858_s3 + $0x10] sm:$0xff]  }
   0x4   :  { %643 = vmatprep.subr.bf16.mxu0 %v713_v1  ;;  %695 = vmatprep.subr.bf16.mxu1 %v723_v7  ;;  %v718_v10 = vld [vmem:[%s857_s0 + $0x18] sm:$0xff]   ;;  %v719_v11 = vld [vmem:[%s857_s0 + $0x20] sm:$0xff]   ;;  %v720_v14 = vld [vmem:[%s857_s0 + $0x28] sm:$0xff]  }
   0x5   :  { %703 = vmatpush3.bf16.msra.mxu1 %v723_v7  ;;  %v726_v12 = vld [vmem:[%s858_s3 + $0x18] sm:$0xff]   ;;  %v727_v13 = vld [vmem:[%s858_s3 + $0x20] sm:$0xff]   ;;  %v721_v15 = vld [vmem:[%s857_s0 + $0x30] sm:$0xff]  }
   0x6   :  { %696 = vmatprep.subr.bf16.mxu1 %v724_v8  ;;  %v728_v16 = vld [vmem:[%s858_s3 + $0x28] sm:$0xff]   ;;  %v722_v17 = vld [vmem:[%s857_s0 + $0x38] sm:$0xff]   ;;  %v729_v18 = vld [vmem:[%s858_s3 + $0x30] sm:$0xff]  }
   0x7   :  { %644 = vmatpush3.bf16.msra.mxu0 %v713_v1  ;;  %v730_v19 = vld [vmem:[%s858_s3 + $0x38] sm:$0xff]   ;;  %v506_v20 = vld [vmem:[%s859_s2] ss:$0 sm:$0xff] }
   0x8   :  { %711 = vmatprep.subr.msk.bf16.mxu0 %vm129_vm1, %v714_v2 }
   0x9   :  { %704 = vmatpush3.bf16.msra.mxu1 %v724_v8 }
   0xa   :  { %697 = vmatprep.subr.bf16.mxu1 %v725_v9 }
   0xb   :  { %646 = vmatpush3.bf16.msra.mxu0 %v131_v4 }
   0xc   :  { %663 = vmatprep.subr.bf16.mxu0 %v723_v7 }
   0xd   :  { %705 = vmatpush3.bf16.msra.mxu1 %v725_v9 }
   0xe   :  { %648 = vmatmul.mubr.msk.bf16.vlgmr.msra.gmra.mrb[0].mxu0 %vm104_vm0, %v716_v5  ;;  %698 = vmatprep.subr.bf16.mxu1 %v726_v12 }
   0xf   :  { %651 = vmatprep.mubr.msk.bf16.mxu0 %vm104_vm0, %v717_v6  ;;  %664 = vmatpush3.bf16.msra.mxu0 %v723_v7 }
  0x10   :  { %665 = vmatprep.subr.bf16.mxu0 %v724_v8 }
  0x11   :  { %706 = vmatpush3.bf16.msra.mxu1 %v726_v12 }
  0x12   :  { %699 = vmatprep.subr.bf16.mxu1 %v727_v13 }
  0x13   :  { %666 = vmatpush3.bf16.msra.mxu0 %v724_v8 }
  0x14   :  { %667 = vmatprep.subr.bf16.mxu0 %v725_v9 }
  0x15   :  { %707 = vmatpush3.bf16.msra.mxu1 %v727_v13 }
  0x16   :  { %652 = vmatmul.mubr.msk.bf16.gmra.mrb[4].mxu0 %vm104_vm0, %v718_v10  ;;  %700 = vmatprep.subr.bf16.mxu1 %v728_v16 }
  0x17   :  { %655 = vmatprep.mubr.msk.bf16.mxu0 %vm104_vm0, %v719_v11  ;;  %668 = vmatpush3.bf16.msra.mxu0 %v725_v9 }
  0x18   :  { %669 = vmatprep.subr.bf16.mxu0 %v726_v12 }
  0x19   :  { %708 = vmatpush3.bf16.msra.mxu1 %v728_v16 }
  0x1a   :  { %701 = vmatprep.subr.bf16.mxu1 %v729_v18 }
  0x1b   :  { %670 = vmatpush3.bf16.msra.mxu0 %v726_v12 }
  0x1c   :  { %671 = vmatprep.subr.bf16.mxu0 %v727_v13 }
  0x1d   :  { %709 = vmatpush3.bf16.msra.mxu1 %v729_v18 }
  0x1e   :  { %656 = vmatmul.mubr.msk.bf16.gmra.mrb[8].mxu0 %vm104_vm0, %v720_v14  ;;  %702 = vmatprep.subr.bf16.mxu1 %v730_v19  ;;  %v526_v14 = vld [vmem:[%s860_s4] ss:$0 sm:$0xff] }
  0x1f   :  { %659 = vmatprep.mubr.msk.bf16.mxu0 %vm104_vm0, %v721_v15  ;;  %672 = vmatpush3.bf16.msra.mxu0 %v727_v13 }
  0x20   :  { %673 = vmatprep.subr.bf16.mxu0 %v728_v16 }
  0x21   :  { %710 = vmatpush3.bf16.msra.mxu1 %v730_v19 }
  0x23   :  { %674 = vmatpush3.bf16.msra.mxu0 %v728_v16 }
  0x24   :  { %675 = vmatprep.subr.bf16.mxu0 %v729_v18 }
  0x26   :  { %660 = vmatmul.mubr.msk.bf16.gmra.mrb[12].mxu0 %vm104_vm0, %v722_v17 }
  0x27   :  { %676 = vmatpush3.bf16.msra.mxu0 %v729_v18 }
  0x28   :  { %677 = vmatprep.subr.bf16.mxu0 %v730_v19 }
  0x2b   :  { %678 = vmatpush3.bf16.msra.mxu0 %v730_v19 }
  0xe1   :  { %v649_v21 = vpop.f32.mrb[0].mxu0 }
  0xe2   :  { %v176_v22 = vadd.f32 %v649_v21, %v506_v20  ;;  %v167_v23 = vpop.f32.mrb[1].mxu0 }
  0xe3   :  { %v168_v24 = vadd.f32 %v506_v20, %v167_v23  ;;  %v650_v25 = vpop.f32.mrb[2].mxu0 }
  0xe4   :  { %v179_v26 = vadd.f32 %v650_v25, %v506_v20  ;;  %v170_v27 = vpop.f32.mrb[3].mxu0  ;;  %v232_v29 = vmax.f32 %v176_v22, 0.0 }
  0xe5   :  { %v171_v28 = vadd.f32 %v506_v20, %v170_v27  ;;  %v230_v31 = vmax.f32 %v168_v24, 0.0 }
  0xe6   :  { %v233_v30 = vmax.f32 %v179_v26, 0.0 }
  0xe7   :  { %v231_v32 = vmax.f32 %v171_v28, 0.0 }
  0xe8   :  { %v247_v33 = vpack.c.bf16 %v233_v30, %v232_v29 }
  0xe9   :  { %v246_v34 = vpack.c.bf16 %v231_v32, %v230_v31  ;;  %v653_v35 = vpop.f32.mrb[4].mxu0 }
  0xea   :  { %v192_v36 = vadd.f32 %v653_v35, %v506_v20  ;;  %v183_v37 = vpop.f32.mrb[5].mxu0 }
  0xeb   :  { %v184_v38 = vadd.f32 %v506_v20, %v183_v37  ;;  %v654_v39 = vpop.f32.mrb[6].mxu0  ;;  %679 = vmatprep.mubr.bf16.mxu0 %v246_v34 }
  0xec   :  { %v195_v40 = vadd.f32 %v654_v39, %v506_v20  ;;  %v186_v41 = vpop.f32.mrb[7].mxu0  ;;  %680 = vmatmul.mubr.bf16.vlgmr.msra.gmra.mrb[16].mxu0 %v247_v33  ;;  %v236_v43 = vmax.f32 %v192_v36, 0.0 }
  0xed   :  { %v187_v42 = vadd.f32 %v506_v20, %v186_v41  ;;  %v234_v45 = vmax.f32 %v184_v38, 0.0 }
  0xee   :  { %v237_v44 = vmax.f32 %v195_v40, 0.0 }
  0xef   :  { %v235_v46 = vmax.f32 %v187_v42, 0.0 }
  0xf0   :  { %v249_v47 = vpack.c.bf16 %v237_v44, %v236_v43 }
  0xf1   :  { %v657_v48 = vpop.f32.mrb[8].mxu0  ;;  %v248_v49 = vpack.c.bf16 %v235_v46, %v234_v45 }
  0xf2   :  { %v208_v50 = vadd.f32 %v657_v48, %v506_v20  ;;  %v199_v51 = vpop.f32.mrb[9].mxu0 }
  0xf3   :  { %v200_v52 = vadd.f32 %v506_v20, %v199_v51  ;;  %v658_v53 = vpop.f32.mrb[10].mxu0  ;;  %683 = vmatprep.mubr.bf16.mxu1 %v248_v49 }
  0xf4   :  { %v211_v54 = vadd.f32 %v658_v53, %v506_v20  ;;  %v202_v55 = vpop.f32.mrb[11].mxu0  ;;  %684 = vmatmul.mubr.bf16.vlgmr.msra.gmra.mrb[0].mxu1 %v249_v47  ;;  %v240_v57 = vmax.f32 %v208_v50, 0.0 }
  0xf5   :  { %v203_v56 = vadd.f32 %v506_v20, %v202_v55  ;;  %v238_v59 = vmax.f32 %v200_v52, 0.0 }
  0xf6   :  { %v241_v58 = vmax.f32 %v211_v54, 0.0 }
  0xf7   :  { %v239_v60 = vmax.f32 %v203_v56, 0.0 }
  0xf8   :  { %v251_v61 = vpack.c.bf16 %v241_v58, %v240_v57 }
  0xf9   :  { %v250_v62 = vpack.c.bf16 %v239_v60, %v238_v59  ;;  %v661_v63 = vpop.f32.mrb[12].mxu0 }
  0xfa   :  { %v224_v0 = vadd.f32 %v661_v63, %v506_v20  ;;  %v215_v1 = vpop.f32.mrb[13].mxu0 }
  0xfb   :  { %v216_v2 = vadd.f32 %v506_v20, %v215_v1  ;;  %v662_v3 = vpop.f32.mrb[14].mxu0  ;;  %687 = vmatprep.mubr.bf16.mxu1 %v250_v62 }
  0xfc   :  { %v227_v4 = vadd.f32 %v662_v3, %v506_v20  ;;  %v218_v5 = vpop.f32.mrb[15].mxu0  ;;  %688 = vmatmul.mubr.bf16.gmra.mrb[4].mxu1 %v251_v61  ;;  %v244_v7 = vmax.f32 %v224_v0, 0.0 }
  0xfd   :  { %v219_v6 = vadd.f32 %v506_v20, %v218_v5  ;;  %v242_v9 = vmax.f32 %v216_v2, 0.0 }
  0xfe   :  { %v245_v8 = vmax.f32 %v227_v4, 0.0 }
  0xff   :  { %v243_v10 = vmax.f32 %v219_v6, 0.0 }
 0x100   :  { %v253_v11 = vpack.c.bf16 %v245_v8, %v244_v7 }
 0x101   :  { %v252_v12 = vpack.c.bf16 %v243_v10, %v242_v9 }
 0x103   :  { %691 = vmatprep.mubr.bf16.mxu1 %v252_v12 }
 0x104   :  { %692 = vmatmul.mubr.bf16.gmra.mrb[8].mxu1 %v253_v11 }
 0x1bf   :  { %v681_v13 = vpop.f32.mrb[16].mxu0 }
 0x1c0   :  { %v359_v15 = vpop.f32.mrb[17].mxu0  ;;  %v368_v17 = vadd.f32 %v681_v13, %v526_v14 }
 0x1c1   :  { %v682_v16 = vpop.f32.mrb[18].mxu0  ;;  %v360_v21 = vadd.f32 %v526_v14, %v359_v15 }
 0x1c2   :  { %v371_v18 = vadd.f32 %v682_v16, %v526_v14  ;;  %v362_v19 = vpop.f32.mrb[19].mxu0 }
 0x1c3   :  { %v363_v20 = vadd.f32 %v526_v14, %v362_v19 }
 0x1c4   :  { %v575_v22 = vpack.c.bf16 %v371_v18, %v368_v17 }
 0x1c5   :  { %v570_v23 = vpack.c.bf16 %v363_v20, %v360_v21 }
 0x1c6   :  { %607 = vst [vmem:[%s861_s5 + $0x8] sm:$0xff] %v575_v22  }
 0x1c7   :  { %571 = vst [vmem:[%s861_s5] sm:$0xff] %v570_v23   ;;  %v685_v24 = vpop.f32.mrb[0].mxu1 }
 0x1c8   :  { %v375_v25 = vpop.f32.mrb[1].mxu1  ;;  %v384_v27 = vadd.f32 %v685_v24, %v526_v14 }
 0x1c9   :  { %v686_v26 = vpop.f32.mrb[2].mxu1  ;;  %v376_v30 = vadd.f32 %v526_v14, %v375_v25 }
 0x1ca   :  { %v387_v28 = vadd.f32 %v686_v26, %v526_v14  ;;  %v378_v29 = vpop.f32.mrb[3].mxu1 }
 0x1cb   :  { %v379_v31 = vadd.f32 %v526_v14, %v378_v29 }
 0x1cc   :  { %v585_v32 = vpack.c.bf16 %v387_v28, %v384_v27 }
 0x1cd   :  { %v580_v33 = vpack.c.bf16 %v379_v31, %v376_v30 }
 0x1ce   :  { %609 = vst [vmem:[%s861_s5 + $0x18] sm:$0xff] %v585_v32  }
 0x1cf   :  { %608 = vst [vmem:[%s861_s5 + $0x10] sm:$0xff] %v580_v33   ;;  %v689_v34 = vpop.f32.mrb[4].mxu1 }
 0x1d0   :  { %v391_v35 = vpop.f32.mrb[5].mxu1  ;;  %v400_v37 = vadd.f32 %v689_v34, %v526_v14 }
 0x1d1   :  { %v690_v36 = vpop.f32.mrb[6].mxu1  ;;  %v392_v40 = vadd.f32 %v526_v14, %v391_v35 }
 0x1d2   :  { %v403_v38 = vadd.f32 %v690_v36, %v526_v14  ;;  %v394_v39 = vpop.f32.mrb[7].mxu1 }
 0x1d3   :  { %v395_v41 = vadd.f32 %v526_v14, %v394_v39 }
 0x1d4   :  { %v595_v42 = vpack.c.bf16 %v403_v38, %v400_v37 }
 0x1d5   :  { %v590_v43 = vpack.c.bf16 %v395_v41, %v392_v40 }
 0x1d6   :  { %611 = vst [vmem:[%s861_s5 + $0x28] sm:$0xff] %v595_v42  }
 0x1d7   :  { %610 = vst [vmem:[%s861_s5 + $0x20] sm:$0xff] %v590_v43   ;;  %v693_v44 = vpop.f32.mrb[8].mxu1 }
 0x1d8   :  { %v407_v45 = vpop.f32.mrb[9].mxu1  ;;  %v416_v47 = vadd.f32 %v693_v44, %v526_v14 }
 0x1d9   :  { %v694_v46 = vpop.f32.mrb[10].mxu1  ;;  %v408_v50 = vadd.f32 %v526_v14, %v407_v45 }
 0x1da   :  { %v419_v48 = vadd.f32 %v694_v46, %v526_v14  ;;  %v410_v49 = vpop.f32.mrb[11].mxu1 }
 0x1db   :  { %v411_v51 = vadd.f32 %v526_v14, %v410_v49 }
 0x1dc   :  { %v605_v52 = vpack.c.bf16 %v419_v48, %v416_v47 }
 0x1dd   :  { %v600_v53 = vpack.c.bf16 %v411_v51, %v408_v50 }
 0x1de   :  { %613 = vst [vmem:[%s861_s5 + $0x38] sm:$0xff] %v605_v52  }
 0x1df   :  { %612 = vst [vmem:[%s861_s5 + $0x30] sm:$0xff] %v600_v53  }

</bundles_post_ra>
